<compile_context>
chip_gen: v5e
topology: v5e:2x2
jax: 0.10.0
libtpu: 0.0.40
codegen_flags: <defaults>
</compile_context>

<pallas_src>
import jax
import jax.numpy as jnp
from jax.experimental import pallas as pl
from jax.experimental.pallas import tpu as pltpu

BN_EPS = 1e-5


def _round_up(n, m):
    return (n + m - 1) // m * m


def classblock_kernel(x_ref, w1_ref, b1_ref, w2_ref, b2_ref, out_ref):
    # Cast the f32 activation tile to bf16 in-kernel for the MXU; accumulate in f32.
    x = x_ref[...].astype(jnp.bfloat16)
    # Bottleneck linear (inference BN pre-folded into w1/b1): (TM, D) @ (D, Bn) + (1, Bn)
    h = jnp.dot(x, w1_ref[...], preferred_element_type=jnp.float32)
    h = (h + b1_ref[...]).astype(jnp.bfloat16)
    # Classifier linear: (TM, Bn) @ (Bn, C) + (1, C)
    out_ref[...] = (jnp.dot(h, w2_ref[...], preferred_element_type=jnp.float32)
                    + b2_ref[...]).astype(out_ref.dtype)


def _fold_bn(params):
    """Fold inference BatchNorm into the bottleneck linear; pad only the bottleneck
    (contraction) dim to the 128-lane width (one-time weight-side op). Weights -> bf16,
    biases stay f32."""
    inv = params["gamma"] * jax.lax.rsqrt(params["running_var"] + BN_EPS)   # (1, Bn)
    w1 = params["w1"] * inv                                                 # (D, Bn)
    b1 = (params["b1"] - params["running_mean"]) * inv + params["beta"]     # (1, Bn)
    w2, b2 = params["w2"], params["b2"]

    bn = w1.shape[1]
    bnp = _round_up(bn, 128)
    if bnp != bn:
        # Zero columns of w1/b1 meet zero rows of w2 -> logits unchanged.
        w1 = jnp.pad(w1, ((0, 0), (0, bnp - bn)))
        b1 = jnp.pad(b1, ((0, 0), (0, bnp - bn)))
        w2 = jnp.pad(w2, ((0, bnp - bn), (0, 0)))
    return w1.astype(jnp.bfloat16), b1, w2.astype(jnp.bfloat16), b2


def _pick_tile(batch, tile_m):
    # Batch tile: multiple of 8 (sublane); default 512 amortizes the ~0.35 us/step overhead.
    tm = min(tile_m, _round_up(batch, 8))
    if batch > 256:
        # Guarantee >=2 grid steps so v7x can shard batch tiles over its 2 TensorCores,
        # keeping the tile a multiple of 256 (MXU width) when the batch is large enough.
        tm = min(tm, max(256, _round_up(pl.cdiv(batch, 2), 256)))
    return tm


def classblock_forward(x, params, *, tile_m=512, out_dtype=jnp.float32):
    """x: (B, input_dim) float32. Returns (B, class_num) logits in `out_dtype`."""
    B, D = x.shape
    w1, b1, w2, b2 = _fold_bn(params)
    assert w1.shape[0] == D, (w1.shape, D)
    Bnp = w1.shape[1]          # lane-padded bottleneck width
    C = w2.shape[1]            # class count, kept at full size (no padding)

    tm = _pick_tile(B, tile_m)
    grid = (pl.cdiv(B, tm),)   # ragged last block: OOB output rows are masked on store

    # --- VMEM budget (double-buffered x/out tiles + resident weights + intermediates) ---
    out_isz = jnp.dtype(out_dtype).itemsize
    c_lanes = _round_up(C, 128)                      # internal lane-padded out-tile layout
    vmem_est = (2 * tm * D * 4                                        # x tiles (f32)
                + 2 * tm * c_lanes * out_isz                          # out tiles
                + 2 * ((D * Bnp + Bnp * c_lanes) * 2 + (Bnp + c_lanes) * 4)  # weights/biases
                + tm * Bnp * (4 + 2)                                  # h (f32 acc + bf16)
                + tm * c_lanes * 4)                                   # second-matmul f32 acc
    vmem_limit = min(int(vmem_est) * 5 // 4 + (4 << 20), 64 << 20)

    # --- advisory cost model (weights counted once: they are grid-resident) ---
    flops = 2 * B * (D * Bnp + Bnp * C)
    bytes_accessed = (B * D * 4                      # x, f32
                      + (D * Bnp + Bnp * C) * 2      # bf16 weights, fetched once
                      + (Bnp + C) * 4                # biases, f32
                      + B * C * out_isz)             # logits

    def resident(shape):
        # Constant block index -> fetched once, VMEM-resident across all grid steps.
        return pl.BlockSpec(shape, lambda i: (0, 0))

    return pl.pallas_call(
        classblock_kernel,
        out_shape=jax.ShapeDtypeStruct((B, C), out_dtype),
        grid=grid,
        in_specs=[
            pl.BlockSpec((tm, D), lambda i: (i, 0)),   # x tile, pipelined over the batch
            resident((D, Bnp)),                        # folded W1 (bf16)
            resident((1, Bnp)),                        # folded b1 (f32)
            resident((Bnp, C)),                        # W2 (bf16)
            resident((1, C)),                          # b2 (f32)
        ],
        out_specs=pl.BlockSpec((tm, C), lambda i: (i, 0)),   # full class dim, ragged tail masked
        compiler_params=pltpu.CompilerParams(
            dimension_semantics=("parallel",),         # v7x: shard batch tiles over the 2 TCs
            vmem_limit_bytes=vmem_limit),
        cost_estimate=pl.CostEstimate(
            flops=flops, transcendentals=0, bytes_accessed=bytes_accessed),
    )(x, w1, b1, w2, b2)


def init_classblock_params(key, input_dim, class_num, num_bottleneck=512):
    """Deterministic init mirroring weights_init_kaiming / weights_init_classifier."""
    k1, k2 = jax.random.split(key, 2)
    # nn.Linear(input_dim, num_bottleneck), kaiming_normal_ mode='fan_out':
    #   std = sqrt(2 / fan_out) = sqrt(2 / num_bottleneck); bias = 0
    w1 = jax.random.normal(k1, (input_dim, num_bottleneck), jnp.float32) \
        * jnp.sqrt(2.0 / num_bottleneck)
    b1 = jnp.zeros((1, num_bottleneck), jnp.float32)
    # BatchNorm1d(num_bottleneck): weight=1, bias=0, running_mean=0, running_var=1
    gamma = jnp.ones((1, num_bottleneck), jnp.float32)
    beta = jnp.zeros((1, num_bottleneck), jnp.float32)
    running_mean = jnp.zeros((1, num_bottleneck), jnp.float32)
    running_var = jnp.ones((1, num_bottleneck), jnp.float32)
    # classifier nn.Linear(num_bottleneck, class_num): normal std=0.001, bias=0
    w2 = jax.random.normal(k2, (num_bottleneck, class_num), jnp.float32) * 0.001
    b2 = jnp.zeros((1, class_num), jnp.float32)
    return dict(w1=w1, b1=b1, gamma=gamma, beta=beta,
                running_mean=running_mean, running_var=running_var,
                w2=w2, b2=b2)


def classblock_reference(x, p):
    """Pure-JAX f32 reference of the eval-mode PyTorch forward."""
    h = x @ p["w1"] + p["b1"]
    h = (h - p["running_mean"]) / jnp.sqrt(p["running_var"] + BN_EPS) \
        * p["gamma"] + p["beta"]
    return h @ p["w2"] + p["b2"]


if __name__ == "__main__":
    # Small shapes consistent with the module (real model: input_dim=2048,
    # num_bottleneck=512, class_num=751). Here: B=8, D=32, Bneck=64, C=16.
    B, input_dim, num_bottleneck, class_num = 8, 32, 64, 16

    key = jax.random.PRNGKey(0)
    kx, kp = jax.random.split(key)
    x = jax.random.normal(kx, (B, input_dim), jnp.float32)
    params = init_classblock_params(kp, input_dim, class_num, num_bottleneck)

    out = jax.block_until_ready(classblock_forward(x, params))
    ref = classblock_reference(x, params)

    assert out.shape == (B, class_num), out.shape
    # bf16 weights/activations on the MXU vs f32 reference -> loosened tolerance.
    assert jnp.allclose(out, ref, atol=2e-3, rtol=5e-2), \
        f"mismatch vs reference, max abs diff = {jnp.max(jnp.abs(out - ref))}"

    print("KERNEL_OK")
</pallas_src>

<mosaic_0001>
module attributes {stable_mosaic.version = 11 : i64} {
  func.func @classblock_kernel(%arg0: i32, %arg1: memref<8x32xf32, #tpu.memory_space<vmem>>, %arg2: memref<32x128xbf16, #tpu.memory_space<vmem>>, %arg3: memref<1x128xf32, #tpu.memory_space<vmem>>, %arg4: memref<128x16xbf16, #tpu.memory_space<vmem>>, %arg5: memref<1x16xf32, #tpu.memory_space<vmem>>, %arg6: memref<8x16xf32, #tpu.memory_space<vmem>>) attributes {dimension_semantics = [#tpu.dimension_semantics<parallel>], iteration_bounds = array<i64: 1>, scalar_prefetch = 0 : i64, scratch_operands = 0 : i64, tpu.core_type = #tpu.core_type<tc>, window_params = [{transform_indices = @transform_0, window_bounds = array<i64: 8, 32>}, {pipeline_mode = #tpu.pipeline_mode<synchronous>, transform_indices = @transform_1, window_bounds = array<i64: 32, 128>}, {pipeline_mode = #tpu.pipeline_mode<synchronous>, transform_indices = @transform_2, window_bounds = array<i64: 1, 128>}, {pipeline_mode = #tpu.pipeline_mode<synchronous>, transform_indices = @transform_3, window_bounds = array<i64: 128, 16>}, {pipeline_mode = #tpu.pipeline_mode<synchronous>, transform_indices = @transform_4, window_bounds = array<i64: 1, 16>}, {transform_indices = @transform_5, window_bounds = array<i64: 8, 16>}]} {
    %c0 = arith.constant 0 : index
    %c0_0 = arith.constant 0 : index
    %0 = vector.load %arg1[%c0, %c0_0] : memref<8x32xf32, #tpu.memory_space<vmem>>, vector<8x32xf32>
    %1 = arith.truncf %0 : vector<8x32xf32> to vector<8x32xbf16>
    %c0_1 = arith.constant 0 : index
    %c0_2 = arith.constant 0 : index
    %2 = vector.load %arg2[%c0_1, %c0_2] : memref<32x128xbf16, #tpu.memory_space<vmem>>, vector<32x128xbf16>
    %cst = arith.constant dense<0.000000e+00> : vector<8x128xf32>
    %3 = tpu.matmul %1, %2, %cst {dimension_numbers = #tpu.dot_dimension_numbers<[1], [0], [0], [1], [0, 0, 1, 1], [], []>} : vector<8x32xbf16>, vector<32x128xbf16>, vector<8x128xf32> -> vector<8x128xf32>
    %c0_3 = arith.constant 0 : index
    %c0_4 = arith.constant 0 : index
    %4 = vector.load %arg3[%c0_3, %c0_4] : memref<1x128xf32, #tpu.memory_space<vmem>>, vector<1x128xf32>
    %5 = vector.broadcast %4 : vector<1x128xf32> to vector<8x128xf32>
    %6 = arith.addf %3, %5 : vector<8x128xf32>
    %7 = arith.truncf %6 : vector<8x128xf32> to vector<8x128xbf16>
    %c0_5 = arith.constant 0 : index
    %c0_6 = arith.constant 0 : index
    %8 = vector.load %arg4[%c0_5, %c0_6] : memref<128x16xbf16, #tpu.memory_space<vmem>>, vector<128x16xbf16>
    %cst_7 = arith.constant dense<0.000000e+00> : vector<8x16xf32>
    %9 = tpu.matmul %7, %8, %cst_7 {dimension_numbers = #tpu.dot_dimension_numbers<[1], [0], [0], [1], [0, 0, 1, 1], [], []>} : vector<8x128xbf16>, vector<128x16xbf16>, vector<8x16xf32> -> vector<8x16xf32>
    %c0_8 = arith.constant 0 : index
    %c0_9 = arith.constant 0 : index
    %10 = vector.load %arg5[%c0_8, %c0_9] : memref<1x16xf32, #tpu.memory_space<vmem>>, vector<1x16xf32>
    %11 = vector.broadcast %10 : vector<1x16xf32> to vector<8x16xf32>
    %12 = arith.addf %9, %11 : vector<8x16xf32>
    %c0_10 = arith.constant 0 : index
    %c0_11 = arith.constant 0 : index
    %13 = vector.load %arg6[%c0_10, %c0_11] : memref<8x16xf32, #tpu.memory_space<vmem>>, vector<8x16xf32>
    tpu.vector_store %arg6[%c0_10, %c0_11], %12 {strides = array<i32>} : memref<8x16xf32, #tpu.memory_space<vmem>>, vector<8x16xf32>,
    return
  }
  func.func @transform_0(%arg0: i32) -> (i32, i32) {
    %c0_i32 = arith.constant 0 : i32
    %c0_i32_0 = arith.constant 0 : i32
    return %arg0, %c0_i32 : i32, i32
  }
  func.func @transform_1(%arg0: i32) -> (i32, i32) {
    %c0_i32 = arith.constant 0 : i32
    %c0_i32_0 = arith.constant 0 : i32
    %c0_i32_1 = arith.constant 0 : i32
    return %c0_i32, %c0_i32_0 : i32, i32
  }
  func.func @transform_2(%arg0: i32) -> (i32, i32) {
    %c0_i32 = arith.constant 0 : i32
    %c0_i32_0 = arith.constant 0 : i32
    %c0_i32_1 = arith.constant 0 : i32
    return %c0_i32, %c0_i32_0 : i32, i32
  }
  func.func @transform_3(%arg0: i32) -> (i32, i32) {
    %c0_i32 = arith.constant 0 : i32
    %c0_i32_0 = arith.constant 0 : i32
    %c0_i32_1 = arith.constant 0 : i32
    return %c0_i32, %c0_i32_0 : i32, i32
  }
  func.func @transform_4(%arg0: i32) -> (i32, i32) {
    %c0_i32 = arith.constant 0 : i32
    %c0_i32_0 = arith.constant 0 : i32
    %c0_i32_1 = arith.constant 0 : i32
    return %c0_i32, %c0_i32_0 : i32, i32
  }
  func.func @transform_5(%arg0: i32) -> (i32, i32) {
    %c0_i32 = arith.constant 0 : i32
    %c0_i32_0 = arith.constant 0 : i32
    return %arg0, %c0_i32 : i32, i32
  }
}

</mosaic_0001>

<bundles_post_ra>
// kernel: tpu_custom_call.1
= control target key start
LH: loop header
LB: loop body
LE: loop exit
PB: predicated region body
PF: predicated region fallthrough
CT: control target
= control target key end

     0   :  { %s314_s0 = inlined_call_operand.vmem [shape: f32[8,32], index: 0, kind: input, shape index: {}]   ;;  %s315_s1 = inlined_call_operand.vmem [shape: bf16[32,128], index: 1, kind: input, shape index: {}]   ;;  %s316_s2 = inlined_call_operand.vmem [shape: f32[1,128], index: 2, kind: input, shape index: {}]   ;;  %s317_s3 = inlined_call_operand.vmem [shape: bf16[128,16], index: 3, kind: input, shape index: {}]   ;;  %s318_s4 = inlined_call_operand.vmem [shape: f32[1,16], index: 4, kind: input, shape index: {}]   ;;  %s319_s5 = inlined_call_operand.hbm [shape: f32[8,16], index: 5, kind: output, shape index: {}]  }
   0x1   :  { %v203_v0 = vld [vmem:[%s315_s1 + $0x8] sm:$0xff]  ;;  %v211_v1 = vld [vmem:[%s317_s3 + $0x38] sm:$0xff]  ;;  %v202_v2 = vld [vmem:[%s315_s1] sm:$0xff] }
   0x2   :  { %54 = vmatpush.bf16.msra.mxu0 %v203_v0  ;;  %v22_v3 = vld [vmem:[%s314_s0] sm:$0xff]  ;;  %130 = vmatpush.bf16.msra.mxu1 %v211_v1  ;;  %v210_v4 = vld [vmem:[%s317_s3 + $0x30] sm:$0xff] }
   0x3   :  { %10 = vsyncpa [#allocation3], 0  ;;  %v23_v5 = vpack.c.bf16 %v22_v3, %v22_v3  ;;  %vm44_vm0 = vcmask 261120   ;;  %v209_v6 = vld [vmem:[%s317_s3 + $0x28] sm:$0xff]  ;;  %v208_v7 = vld [vmem:[%s317_s3 + $0x20] sm:$0xff]  ;;  %s241_s17 = smov [#allocation2]  }
   0x4   :  { %v207_v8 = vld [vmem:[%s317_s3 + $0x18] sm:$0xff]  ;;  %v206_v9 = vld [vmem:[%s317_s3 + $0x10] sm:$0xff]  ;;  %v205_v10 = vld [vmem:[%s317_s3 + $0x8] sm:$0xff]  ;;  %s150_s18 = sshll.u32 %s241_s17, 4  ;;  %vm143_vm1 = vcmask 130048   ;;  %s151_s18 = int_to_ptr.vmem [resolvable:$true] %s150_s18 }
   0x5   :  { %v204_v11 = vld [vmem:[%s317_s3] sm:$0xff]  ;;  %s152_s3 = sshll.u32 %s319_s5, 4  ;;  %s153_s3 = int_to_ptr.hbm [resolvable:$true] %s152_s3 }
   0x6   :  { %55 = vmatpush.bf16.msra.mxu0 %v202_v2  ;;  %131 = vmatpush.bf16.msra.mxu1 %v210_v4  ;;  %v213_v12 = vld [vmem:[%s316_s2] ss:$0 sm:$0xff] }
   0x7   :  { %v214_v17 = vld [vmem:[%s318_s4] ss:$0 sm:$0xff] }
   0x9   :  { %169 = vmatmul.msk.bf16.vlgmr.msra.gmra.mxu0 %vm44_vm0, %v23_v5 }
   0xa   :  { %132 = vmatpush.bf16.msra.mxu1 %v209_v6 }
   0xe   :  { %133 = vmatpush.bf16.msra.mxu1 %v208_v7 }
  0x12   :  { %134 = vmatpush.bf16.msra.mxu1 %v207_v8 }
  0x16   :  { %135 = vmatpush.bf16.msra.mxu1 %v206_v9 }
  0x1a   :  { %136 = vmatpush.bf16.msra.mxu1 %v205_v10 }
  0x1e   :  { %137 = vmatpush.bf16.msra.mxu1 %v204_v11 }
  0x86   :  { %v57_v13 = vpop.f32.mrf.mxu0 }
  0x87   :  { %v58_v14 = vadd.f32 %v213_v12, %v57_v13 }
  0x89   :  { %v61_v15 = vpack.c.bf16 %v58_v14, %v58_v14 }
  0x8b   :  { %138 = vmatmul.bf16.vlgmr.msra.gmra.mxu1 %v61_v15 }
  0x8e   :  { %v59_v16 = vpop.f32.mrf.mxu0 }
 0x108   :  { %v139_v18 = vpop.f32.mrf.mxu1 }
 0x109   :  { %v140_v19 = vadd.f32 %v214_v17, %v139_v18 }
 0x10b   :  { %144 = vst.msk [vmem:[#allocation2] sm:$0xff] %vm143_vm1, %v140_v19 }
 0x10c   :  { %155 = dma.vmem_to_hbm [thread:$0]  %s151_s18, 128, %s153_s3, [#allocation3]  }
 0x110   :  { %v141_v20 = vpop.f32.mrf.mxu1 }
 0x111   :  { %239 = dma.done.wait [#allocation3], 128  }
 0x112   :  { %240 = vsyncadd [#allocation3], 4294967168 }
 0x113   :  { %160 = vsyncpa [#allocation3], 1 }

</bundles_post_ra>
